<compile_context>
chip_gen: v7x
topology: tpu7x:2x2x1
jax: 0.10.0
libtpu: 0.0.40
codegen_flags: <defaults>
</compile_context>

<pallas_src>
import functools

import jax
import jax.numpy as jnp
from jax.experimental import pallas as pl
from jax.experimental.pallas import tpu as pltpu


# Target bytes for one (nc_pad, tk) feature slab (per pipeline buffer).
_DEF_SLAB_BYTES = 3 * 1024 * 1024


def _pad_up(x: int, m: int) -> int:
    return ((x + m - 1) // m) * m


def _choose_tk(nc_pad, hw_pad, itemsize, max_slab_bytes):
    """Largest K tile that (a) is a multiple of 128, (b) divides hw_pad exactly
    (so no extra HW padding is introduced by the tiling) and (c) keeps one
    (nc_pad, tk) slab under max_slab_bytes."""
    cap = max(128, (max_slab_bytes // max(1, nc_pad * itemsize)) // 128 * 128)
    cap = min(cap, hw_pad)
    n128 = hw_pad // 128
    best = 1
    for d in range(1, n128 + 1):
        if n128 % d == 0 and d * 128 <= cap:
            best = d
    return best * 128


def _prep_features(x_nchw, max_slab_bytes):
    """Flatten NCHW -> (nc_pad, hw_pad).  The jnp.pad HBM copy happens only
    when truly unavoidable (nc % 8 != 0 or hw % 128 != 0); zero rows/cols
    contribute nothing to the Gram."""
    n, c, h, w = x_nchw.shape
    nc, hw = n * c, h * w
    feats = x_nchw.reshape(nc, hw)

    nc_pad = _pad_up(nc, 8)       # sublane alignment
    hw_pad = _pad_up(hw, 128)     # lane alignment
    if nc_pad != nc or hw_pad != hw:
        feats = jnp.pad(feats, ((0, nc_pad - nc), (0, hw_pad - hw)))

    tk = _choose_tk(nc_pad, hw_pad, feats.dtype.itemsize, max_slab_bytes)
    norm = float(nc * hw)         # true N*C*H*W normalizer
    return feats, nc, nc_pad, hw_pad, tk, norm


def _default_num_splits():
    """2-way K split only if the chip exposes >1 TensorCore (v7x / megacore)."""
    try:
        n = int(getattr(jax.devices()[0], "num_cores", 1) or 1)
    except Exception:
        n = 1
    return max(1, min(2, n))


def _resolve_splits(num_splits, n_k):
    splits = _default_num_splits() if num_splits is None else int(num_splits)
    splits = max(1, splits)
    if splits > 1 and (n_k % splits != 0):
        splits = 1                # uneven split would index out of range
    return splits


def _vmem_limit_bytes(nc_pad, tk, itemsize, n_gram_tiles):
    est = 2 * nc_pad * tk * itemsize            # double-buffered feature slabs
    est += n_gram_tiles * nc_pad * nc_pad * 4   # accumulator / target / output
    est += 2 * 1024 * 1024                      # compiler scratch margin
    return int(max(est, 32 * 1024 * 1024))


# ----------------------------------------------------------------------------
# Kernels
# ----------------------------------------------------------------------------
def _gram_partial_kernel(feat_ref, gram_ref, *, compute_dtype, inv_norm):
    """K-tiled Gram accumulation directly into the resident output block.

    grid = (num_splits, k_steps); output block index depends only on the split
    axis, so the block stays in VMEM across the whole K loop of that split.
    """
    k = pl.program_id(1)

    @pl.when(k == 0)
    def _():
        gram_ref[...] = jnp.zeros_like(gram_ref)

    # bf16 operands keep the MXU in single-pass mode; accumulation stays f32.
    f = feat_ref[...].astype(compute_dtype)
    # F_k @ F_k^T without an explicit transpose (contract dim 1 of both).
    # TODO(synk): if a bundle dump ever shows a per-step vxpose here, switch to
    # pl.dot(f, f, trans_b=True); also exploit Gram symmetry (lower-triangular
    # output tiles) once an (i, j) output tiling exists and NC is large enough
    # for the kernel to be MXU-bound.
    gram_ref[...] += jax.lax.dot_general(
        f, f,
        dimension_numbers=(((1,), (1,)), ((), ())),
        preferred_element_type=jnp.float32,
    )

    @pl.when(k == pl.num_programs(1) - 1)
    def _():
        gram_ref[...] = gram_ref[...] * inv_norm


def _style_loss_kernel(feat_ref, target_ref, loss_ref, acc_ref, *,
                       compute_dtype, inv_norm, inv_count):
    """Single-core path: Gram accumulation + L1 vs. the target Gram.

    Only the scalar loss leaves the kernel (to SMEM); the Gram never touches
    HBM.  Padded rows/cols are zero in both Grams, so the sum is exact and the
    mean divides by the true NC^2.
    """
    k = pl.program_id(0)

    @pl.when(k == 0)
    def _():
        acc_ref[...] = jnp.zeros_like(acc_ref)

    f = feat_ref[...].astype(compute_dtype)
    acc_ref[...] += jax.lax.dot_general(
        f, f,
        dimension_numbers=(((1,), (1,)), ((), ())),
        preferred_element_type=jnp.float32,
    )

    @pl.when(k == pl.num_programs(0) - 1)
    def _():
        g = acc_ref[...] * inv_norm
        loss_ref[0] = jnp.sum(jnp.abs(g - target_ref[...])) * inv_count


# ----------------------------------------------------------------------------
# pallas_call wrappers
# ----------------------------------------------------------------------------
def _gram_partials_call(feats, nc_pad, hw_pad, tk, splits, compute_dtype,
                        inv_norm):
    """Returns (splits, nc_pad, nc_pad) normalized partial Grams."""
    itemsize = feats.dtype.itemsize
    n_k = hw_pad // tk
    k_steps = n_k // splits

    return pl.pallas_call(
        functools.partial(_gram_partial_kernel,
                          compute_dtype=compute_dtype, inv_norm=inv_norm),
        out_shape=jax.ShapeDtypeStruct((splits, nc_pad, nc_pad), jnp.float32),
        grid=(splits, k_steps),
        in_specs=[pl.BlockSpec((nc_pad, tk),
                               lambda s, k: (0, s * k_steps + k))],
        # Leading dim squeezed; block index constant along K -> resident
        # accumulator, written back only when the split index changes.
        out_specs=pl.BlockSpec((None, nc_pad, nc_pad), lambda s, k: (s, 0, 0)),
        compiler_params=pltpu.CompilerParams(
            dimension_semantics=("parallel", "arbitrary"),
            vmem_limit_bytes=_vmem_limit_bytes(nc_pad, tk, itemsize, 3)),
        cost_estimate=pl.CostEstimate(
            flops=2 * nc_pad * nc_pad * hw_pad,
            transcendentals=0,
            bytes_accessed=nc_pad * hw_pad * itemsize
            + splits * nc_pad * nc_pad * 4),
    )(feats)


def _gram_padded(x_nchw, *, compute_dtype=jnp.bfloat16, num_splits=None,
                 max_slab_bytes=_DEF_SLAB_BYTES):
    """Padded normalized Gram matrix (nc_pad, nc_pad) of an NCHW tensor."""
    feats, nc, nc_pad, hw_pad, tk, norm = _prep_features(x_nchw, max_slab_bytes)
    splits = _resolve_splits(num_splits, hw_pad // tk)
    partials = _gram_partials_call(feats, nc_pad, hw_pad, tk, splits,
                                   compute_dtype, 1.0 / norm)
    gram_pad = partials[0] if splits == 1 else jnp.sum(partials, axis=0)
    return gram_pad, nc


def gram_matrix(x_nchw, *, compute_dtype=jnp.bfloat16, num_splits=None,
                max_slab_bytes=_DEF_SLAB_BYTES):
    """Normalized Gram matrix of an NCHW tensor (un-padded view)."""
    gram_pad, nc = _gram_padded(x_nchw, compute_dtype=compute_dtype,
                                num_splits=num_splits,
                                max_slab_bytes=max_slab_bytes)
    return gram_pad[:nc, :nc]


def style_loss_forward(x_nchw, target_gram_padded, *,
                       compute_dtype=jnp.bfloat16, num_splits=None,
                       max_slab_bytes=_DEF_SLAB_BYTES):
    """Returns (input, l1_loss(gram(input), target_gram))."""
    feats, nc, nc_pad, hw_pad, tk, norm = _prep_features(x_nchw, max_slab_bytes)
    if target_gram_padded.shape != (nc_pad, nc_pad):
        raise ValueError(
            f"StyleLoss: input implies a padded Gram of shape "
            f"{(nc_pad, nc_pad)}, but the target Gram has shape "
            f"{target_gram_padded.shape} (was the module built with a "
            f"feature map of different N*C?)")

    n_k = hw_pad // tk
    splits = _resolve_splits(num_splits, n_k)
    inv_norm = 1.0 / norm
    itemsize = feats.dtype.itemsize

    if splits == 1:
        # Single-core path: Gram stays in VMEM, only a scalar loss leaves.
        loss = pl.pallas_call(
            functools.partial(
                _style_loss_kernel,
                compute_dtype=compute_dtype,
                inv_norm=inv_norm,
                inv_count=1.0 / float(nc * nc),
            ),
            out_shape=jax.ShapeDtypeStruct((1,), jnp.float32),
            grid=(n_k,),
            in_specs=[
                pl.BlockSpec((nc_pad, tk), lambda k: (0, k)),
                # Constant block index -> the pipeline fetches the target Gram
                # once and keeps it resident across the whole K loop.
                pl.BlockSpec((nc_pad, nc_pad), lambda k: (0, 0)),
            ],
            out_specs=pl.BlockSpec(memory_space=pltpu.MemorySpace.SMEM),
            scratch_shapes=[pltpu.VMEM((nc_pad, nc_pad), jnp.float32)],
            compiler_params=pltpu.CompilerParams(
                dimension_semantics=("arbitrary",),
                vmem_limit_bytes=_vmem_limit_bytes(nc_pad, tk, itemsize, 4)),
            cost_estimate=pl.CostEstimate(
                flops=2 * nc_pad * nc_pad * hw_pad,
                transcendentals=0,
                bytes_accessed=nc_pad * hw_pad * itemsize
                + nc_pad * nc_pad * 4),
        )(feats, target_gram_padded)
        return x_nchw, loss[0]

    # Dual-core path (v7x): split K across a leading "parallel" axis so each
    # TensorCore streams half of HBM, then combine + L1 in a tiny jnp epilogue.
    partials = _gram_partials_call(feats, nc_pad, hw_pad, tk, splits,
                                   compute_dtype, inv_norm)
    g = jnp.sum(partials, axis=0)[:nc, :nc]
    t = target_gram_padded[:nc, :nc]
    return x_nchw, jnp.mean(jnp.abs(g - t))


class StyleLoss:
    """JAX/Pallas port of the PyTorch StyleLoss module (identity forward,
    loss stored on `self.loss`)."""

    def __init__(self, target_feature, *, compute_dtype=jnp.bfloat16,
                 num_splits=None, max_slab_bytes=_DEF_SLAB_BYTES):
        self._compute_dtype = compute_dtype
        self._num_splits = num_splits
        self._max_slab_bytes = max_slab_bytes
        gram_pad, nc = _gram_padded(
            jax.lax.stop_gradient(target_feature),
            compute_dtype=compute_dtype, num_splits=num_splits,
            max_slab_bytes=max_slab_bytes)
        self._target_padded = jax.lax.stop_gradient(gram_pad)
        self._nc = nc
        self.loss = None

    def __call__(self, x):
        out, loss = style_loss_forward(
            x, self._target_padded,
            compute_dtype=self._compute_dtype,
            num_splits=self._num_splits,
            max_slab_bytes=self._max_slab_bytes)
        self.loss = loss
        return out


# ----------------------------------------------------------------------------
# Demo / self-check
# ----------------------------------------------------------------------------
if __name__ == "__main__":
    key = jax.random.PRNGKey(0)
    k_t, k_x, k_t2, k_x2 = jax.random.split(key, 4)

    def ref_gram(a, compute_dtype=jnp.float32):
        n, c, h, w = a.shape
        f = a.reshape(n * c, h * w).astype(compute_dtype).astype(jnp.float32)
        g = jax.lax.dot_general(
            f, f, dimension_numbers=(((1,), (1,)), ((), ())),
            precision=jax.lax.Precision.HIGHEST,
            preferred_element_type=jnp.float32)
        return g / (n * c * h * w)

    def ref_loss(a, t, compute_dtype=jnp.float32):
        return jnp.mean(jnp.abs(ref_gram(a, compute_dtype)
                                - ref_gram(t, compute_dtype)))

    # Small shapes consistent with the module: batch=2, channels=4, spatial=16.
    N, C, H, W = 2, 4, 16, 16
    target = jax.random.normal(k_t, (N, C, H, W), dtype=jnp.float32)
    x = jax.random.normal(k_x, (N, C, H, W), dtype=jnp.float32)

    # 1. f32-operand path vs. f32 reference; forward is an exact pass-through.
    m_f32 = StyleLoss(target, compute_dtype=jnp.float32)
    out = jax.block_until_ready(m_f32(x))
    loss_f32 = jax.block_until_ready(m_f32.loss)
    assert out.shape == x.shape and bool(jnp.all(out == x))
    assert jnp.allclose(loss_f32, ref_loss(x, target), rtol=1e-4, atol=1e-6)

    # 2. Default bf16-operand path (f32 accumulation) vs. a matching reference,
    #    plus a sanity bound against the f32 loss.
    m_bf16 = StyleLoss(target)
    _ = jax.block_until_ready(m_bf16(x))
    loss_bf16 = jax.block_until_ready(m_bf16.loss)
    assert jnp.allclose(loss_bf16, ref_loss(x, target, jnp.bfloat16),
                        rtol=1e-4, atol=1e-6)
    assert jnp.allclose(loss_bf16, loss_f32, rtol=5e-2, atol=1e-4)

    # 3. Standalone gram_matrix helper.
    assert jnp.allclose(gram_matrix(x, compute_dtype=jnp.float32),
                        ref_gram(x), rtol=1e-4, atol=1e-6)

    # 4. Multi-step K reduction: (a) explicit 2-way split (partial-Gram kernel
    #    + epilogue, the v7x path) and (b) single split (scalar-loss kernel).
    #    A tiny slab budget forces tk=128 -> 2 K steps at these shapes.
    m_split = StyleLoss(target, compute_dtype=jnp.float32,
                        num_splits=2, max_slab_bytes=4096)
    _ = jax.block_until_ready(m_split(x))
    assert jnp.allclose(m_split.loss, ref_loss(x, target),
                        rtol=1e-4, atol=1e-6)

    m_multk = StyleLoss(target, compute_dtype=jnp.float32,
                        num_splits=1, max_slab_bytes=4096)
    _ = jax.block_until_ready(m_multk(x))
    assert jnp.allclose(m_multk.loss, ref_loss(x, target),
                        rtol=1e-4, atol=1e-6)

    # 5. Shapes that exercise the (rare) padding path: nc=3 -> 8, hw=144 -> 256.
    N2, C2, H2, W2 = 1, 3, 12, 12
    target2 = jax.random.normal(k_t2, (N2, C2, H2, W2), dtype=jnp.float32)
    x2 = jax.random.normal(k_x2, (N2, C2, H2, W2), dtype=jnp.float32)
    m_pad = StyleLoss(target2, compute_dtype=jnp.float32)
    out2 = jax.block_until_ready(m_pad(x2))
    assert bool(jnp.all(out2 == x2))
    assert jnp.allclose(m_pad.loss, ref_loss(x2, target2),
                        rtol=1e-4, atol=1e-6)

    print("KERNEL_OK")
</pallas_src>

<mosaic_0001>
module attributes {stable_mosaic.version = 11 : i64} {
  func.func @_gram_partial_kernel(%arg0: i32, %arg1: i32, %arg2: memref<8x256xf32, #tpu.memory_space<vmem>>, %arg3: memref<1x8x8xf32, #tpu.memory_space<vmem>>) attributes {dimension_semantics = [#tpu.dimension_semantics<parallel>, #tpu.dimension_semantics<arbitrary>], iteration_bounds = array<i64: 1, 1>, scalar_prefetch = 0 : i64, scratch_operands = 0 : i64, tpu.core_type = #tpu.core_type<tc>, window_params = [{transform_indices = @transform_0, window_bounds = array<i64: 8, 256>}, {transform_indices = @transform_1, window_bounds = array<i64: 1, 8, 8>}]} {
    %c0_i32 = arith.constant 0 : i32
    %0 = arith.cmpi eq, %arg1, %c0_i32 : i32
    %1 = arith.extui %0 : i1 to i32
    %c0_i32_0 = arith.constant 0 : i32
    %2 = arith.cmpi ne, %1, %c0_i32_0 : i32
    scf.if %2 {
      %cst_10 = arith.constant 0.000000e+00 : f32
      %14 = vector.broadcast %cst_10 : f32 to vector<8x8xf32>
      %c0_11 = arith.constant 0 : index
      %c0_12 = arith.constant 0 : index
      %c0_13 = arith.constant 0 : index
      %15 = vector.load %arg3[%c0_11, %c0_12, %c0_13] : memref<1x8x8xf32, #tpu.memory_space<vmem>>, vector<1x8x8xf32>
      %16 = vector.shape_cast %15 : vector<1x8x8xf32> to vector<8x8xf32>
      %17 = vector.shape_cast %14 : vector<8x8xf32> to vector<1x8x8xf32>
      tpu.vector_store %arg3[%c0_11, %c0_12, %c0_13], %17 {strides = array<i32>} : memref<1x8x8xf32, #tpu.memory_space<vmem>>, vector<1x8x8xf32>,
    } else {
    }
    %c0 = arith.constant 0 : index
    %c0_1 = arith.constant 0 : index
    %3 = vector.load %arg2[%c0, %c0_1] : memref<8x256xf32, #tpu.memory_space<vmem>>, vector<8x256xf32>
    %c0_2 = arith.constant 0 : index
    %c0_3 = arith.constant 0 : index
    %c0_4 = arith.constant 0 : index
    %4 = vector.load %arg3[%c0_2, %c0_3, %c0_4] : memref<1x8x8xf32, #tpu.memory_space<vmem>>, vector<1x8x8xf32>
    %5 = vector.shape_cast %4 : vector<1x8x8xf32> to vector<8x8xf32>
    %cst = arith.constant dense<0.000000e+00> : vector<8x8xf32>
    %6 = tpu.matmul %3, %3, %cst {dimension_numbers = #tpu.dot_dimension_numbers<[1], [1], [0], [0], [0, 0, 1, 0], [], []>} : vector<8x256xf32>, vector<8x256xf32>, vector<8x8xf32> -> vector<8x8xf32>
    %7 = arith.addf %5, %6 : vector<8x8xf32>
    %c0_5 = arith.constant 0 : index
    %c0_6 = arith.constant 0 : index
    %c0_7 = arith.constant 0 : index
    %8 = vector.load %arg3[%c0_5, %c0_6, %c0_7] : memref<1x8x8xf32, #tpu.memory_space<vmem>>, vector<1x8x8xf32>
    %9 = vector.shape_cast %8 : vector<1x8x8xf32> to vector<8x8xf32>
    %10 = vector.shape_cast %7 : vector<8x8xf32> to vector<1x8x8xf32>
    tpu.vector_store %arg3[%c0_5, %c0_6, %c0_7], %10 {strides = array<i32>} : memref<1x8x8xf32, #tpu.memory_space<vmem>>, vector<1x8x8xf32>,
    %c0_i32_8 = arith.constant 0 : i32
    %11 = arith.cmpi eq, %arg1, %c0_i32_8 : i32
    %12 = arith.extui %11 : i1 to i32
    %c0_i32_9 = arith.constant 0 : i32
    %13 = arith.cmpi ne, %12, %c0_i32_9 : i32
    scf.if %13 {
      %c0_10 = arith.constant 0 : index
      %c0_11 = arith.constant 0 : index
      %c0_12 = arith.constant 0 : index
      %14 = vector.load %arg3[%c0_10, %c0_11, %c0_12] : memref<1x8x8xf32, #tpu.memory_space<vmem>>, vector<1x8x8xf32>
      %15 = vector.shape_cast %14 : vector<1x8x8xf32> to vector<8x8xf32>
      %cst_13 = arith.constant 4.8828125E-4 : f32
      %16 = vector.broadcast %cst_13 : f32 to vector<8x8xf32>
      %17 = arith.mulf %15, %16 : vector<8x8xf32>
      %c0_14 = arith.constant 0 : index
      %c0_15 = arith.constant 0 : index
      %c0_16 = arith.constant 0 : index
      %18 = vector.load %arg3[%c0_14, %c0_15, %c0_16] : memref<1x8x8xf32, #tpu.memory_space<vmem>>, vector<1x8x8xf32>
      %19 = vector.shape_cast %18 : vector<1x8x8xf32> to vector<8x8xf32>
      %20 = vector.shape_cast %17 : vector<8x8xf32> to vector<1x8x8xf32>
      tpu.vector_store %arg3[%c0_14, %c0_15, %c0_16], %20 {strides = array<i32>} : memref<1x8x8xf32, #tpu.memory_space<vmem>>, vector<1x8x8xf32>,
    } else {
    }
    return
  }
  func.func @transform_0(%arg0: i32, %arg1: i32) -> (i32, i32) {
    %c1_i32 = arith.constant 1 : i32
    %0 = arith.muli %arg0, %c1_i32 : i32
    %1 = arith.addi %0, %arg1 : i32
    %c0_i32 = arith.constant 0 : i32
    %c0_i32_0 = arith.constant 0 : i32
    return %c0_i32, %1 : i32, i32
  }
  func.func @transform_1(%arg0: i32, %arg1: i32) -> (i32, i32, i32) {
    %c0_i32 = arith.constant 0 : i32
    %c0_i32_0 = arith.constant 0 : i32
    %c0_i32_1 = arith.constant 0 : i32
    return %arg0, %c0_i32, %c0_i32_0 : i32, i32, i32
  }
}

</mosaic_0001>

<bundles_post_ra>
// kernel: tpu_custom_call.1
= control target key start
LH: loop header
LB: loop body
LE: loop exit
PB: predicated region body
PF: predicated region fallthrough
CT: control target
= control target key end

     0   :  { %6 = vsyncpa [#allocation3], 0  ;;  %s221_s0 = inlined_call_operand.hbm [shape: f32[8,256], index: 0, kind: input, shape index: {}]   ;;  %s222_s1 = inlined_call_operand.hbm [shape: f32[1,8,8], index: 1, kind: output, shape index: {}]  }
   0x1   :  { %7 = vsyncpa [#allocation4], 0  ;;  %s181_s6 = smov [#allocation2]   ;;  %s133_s10 = scalar_lea.hbm %s221_s0, 256 }
   0x2   :  { %s18_s7 = sshll.u32 %s181_s6, 4  ;;  %p134_p0 = scmp.ne.s32.totalorder %s221_s0, %s133_s10  ;;  %s19_s7 = int_to_ptr.vmem [resolvable:$true] %s18_s7 }
   0x3   :  { %p137_p1 = scmp.lt.u32.totalorder %s133_s10, %s221_s0 }
   0x5   :  { %p139_p2 = pnand %p137_p1, %p134_p0 }
   0x7   :  { %142 = shalt.err (!%p139_p2)
}
   0x8   :  { %s143_s15 = scalar_lea.vmem %s19_s7, 256  ;;  %p148_p4 = scmp.lt.s32.totalorder %s19_s7, %s19_s7 }
   0x9   :  { %p144_p3 = scmp.ne.s32.totalorder %s19_s7, %s143_s15  ;;  %p149_p5 = scmp.lt.s32.totalorder %s143_s15, %s143_s15 }
   0xb   :  { %p150_p6 = por %p149_p5, %p148_p4 }
   0xd   :  { %p151_p7 = pnand %p150_p6, %p144_p3 }
   0xf   :  { %154 = shalt.err (!%p151_p7)
}
  0x10   :  { %21 = dma.hbm_to_vmem [thread:$0]  %s221_s0, 256, %s19_s7, [#allocation3]  }
  0x11   :  { %177 = dma.done.wait [#allocation3], 256  }
  0x12   :  { %178 = vsyncadd [#allocation3], 4294967040  ;;  %vm31_vm0 = vcmask 64512   ;;  %v182_v0 = vmov 0.0   ;;  %v34_v1 = vld [vmem:[#allocation2 + $0x8] sm:$0xff]  ;;  %v33_v2 = vld [vmem:[#allocation2] sm:$0xff] }
  0x13   :  { %32 = vst.msk [vmem:[#allocation5] sm:$0xff] %vm31_vm0, %v182_v0  ;;  %36 = vmatprep.subr.mxu0 %v34_v1  ;;  %100 = vmatprep.mubr.f32.mxu0 %v34_v1  ;;  %s183_s18 = smov [#allocation5]  }
  0x14   :  { %37 = vmatpush1.xpose.msra.mxu0 %v33_v2  ;;  %s121_s0 = sshll.u32 %s183_s18, 4  ;;  %s122_s0 = int_to_ptr.vmem [resolvable:$true] %s121_s0 }
  0x15   :  { %s155_s19 = scalar_lea.vmem %s122_s0, 128  ;;  %p160_p9 = scmp.lt.s32.totalorder %s122_s0, %s122_s0 }
  0x16   :  { %p156_p8 = scmp.ne.s32.totalorder %s122_s0, %s155_s19  ;;  %p161_p10 = scmp.lt.s32.totalorder %s155_s19, %s155_s19 }
  0x17   :  { %101 = vmatmul.mubr.f32.vlgmr.msra.gmra.mrb[0].mxu0 %v33_v2 }
  0x18   :  { %p162_p11 = por %p161_p10, %p160_p9 }
  0x1a   :  { %v35_v3 = vld [vmem:[#allocation5] sm:$0xff]  ;;  %p163_p12 = pnand %p162_p11, %p156_p8 }
  0xea   :  { %v102_v4 = vpop.f32.mrb[0].mxu0 }
  0xeb   :  { %v106_v5 = vadd.f32 %v102_v4, %v35_v3  ;;  %v104_v6 = vpop.f32.mrb[1].mxu0 }
  0xed   :  { %108 = vst.msk [vmem:[#allocation5] sm:$0xff] %vm31_vm0, %v106_v5 }
  0xf4   :  { %v112_v7 = vld [vmem:[#allocation5] sm:$0xff] }
  0xf5   :  { %v113_v8 = vmul.f32 0.00048828125, %v112_v7 }
  0xf7   :  { %114 = vst.msk [vmem:[#allocation5] sm:$0xff] %vm31_vm0, %v113_v8 }
  0xf8   :  { %166 = shalt.err (!%p163_p12)
}
  0xf9   :  { %s167_s22 = scalar_lea.hbm %s222_s1, 128 }
  0xfa   :  { %p168_p13 = scmp.ne.s32.totalorder %s222_s1, %s167_s22  ;;  %p171_p0 = scmp.lt.u32.totalorder %s167_s22, %s222_s1 }
  0xfc   :  { %p173_p1 = pnand %p171_p0, %p168_p13 }
  0xfe   :  { %176 = shalt.err (!%p173_p1)
}
  0xff   :  { %124 = dma.vmem_to_hbm [thread:$0]  %s122_s0, 128, %s222_s1, [#allocation4]  }
 0x100   :  { %179 = dma.done.wait [#allocation4], 128  }
 0x101   :  { %180 = vsyncadd [#allocation4], 4294967168 }
 0x102   :  { %128 = vsyncpa [#allocation3], 1 }
 0x103   :  { %129 = vsyncpa [#allocation4], 1 }

</bundles_post_ra>
